<compile_context>
chip_gen: v6e
topology: v6e:2x2x1
jax: 0.10.0
libtpu: 0.0.40
codegen_flags: <defaults>
</compile_context>

<pallas_src>
import jax
import jax.numpy as jnp
from jax.experimental import pallas as pl
from jax.experimental.pallas import tpu as pltpu


def _round_up(x, m):
    return (x + m - 1) // m * m


def _pick_b_tile(B, max_bt=8):
    bt = min(B, max_bt)
    while B % bt:
        bt -= 1
    return bt


def _make_kernel(K, d, pad, Wh, relu_after_conv2, use_conv3, TL, Bt, has_halo):
    two_pad = 2 * pad
    Lh = TL + pad                       # conv1 output width per tile (tile + conv2's halo)
    off = (Wh - two_pad) if has_halo else 0   # first needed column inside the Wh-wide halo

    def kernel(*refs):
        o_ref = refs[-1]
        idx = 0
        xcur = refs[idx][...]; idx += 1                 # (Bt, Cin, TL)  bf16
        halo = None
        if has_halo:
            halo = refs[idx][...]; idx += 1             # (Bt, Cin, Wh)  bf16
        w1 = refs[idx][...]; b1 = refs[idx + 1][...]    # (K, F, Cin) bf16, (F, 1) f32
        w2 = refs[idx + 2][...]; b2 = refs[idx + 3][...]  # (K, Cout, F) bf16, (Cout, 1) f32
        idx += 4
        w3 = b3 = None
        if use_conv3:
            w3 = refs[idx][...]; b3 = refs[idx + 1][...]  # (Cout, Cin) bf16, (Cout, 1) f32

        t = pl.program_id(1)
        if has_halo:
            # Tile 0 has no real left context: causal left zero-padding.
            halo = jnp.where(t > 0, halo, jnp.zeros_like(halo))

        for bi in range(Bt):                             # short unrolled batch loop
            xc = xcur[bi]                                # (Cin, TL) bf16
            if has_halo:
                # Lane-aligned concat (halo width is a 128-multiple): plain block copies.
                xwin = jnp.concatenate([halo[bi], xc], axis=1)   # (Cin, Wh + TL)
            else:
                xwin = xc

            # conv1: K dilated taps accumulated on the MXU in f32.
            h = jnp.dot(w1[0], xwin[:, off:off + Lh],
                        preferred_element_type=jnp.float32)
            for k in range(1, K):
                s = off + k * d
                h = h + jnp.dot(w1[k], xwin[:, s:s + Lh],
                                preferred_element_type=jnp.float32)
            h = jnp.maximum(h + b1, 0.0)                 # bias + ReLU (dropout = identity)
            if has_halo:
                # conv2 sees F.pad(relu(conv1(x))): columns at time < 0 must be exact zeros.
                # Only live for t == 0; a handful of VPU selects per tile otherwise.
                col = jax.lax.broadcasted_iota(jnp.int32, h.shape, 1)
                h = jnp.where(jnp.logical_or(t > 0, col >= pad), h, 0.0)
            hb = h.astype(jnp.bfloat16)                  # bf16 MXU operand for conv2

            # conv2: K dilated taps over the relu(conv1) activations.
            y = jnp.dot(w2[0], hb[:, 0:TL], preferred_element_type=jnp.float32)
            for k in range(1, K):
                s = k * d
                y = y + jnp.dot(w2[k], hb[:, s:s + TL],
                                preferred_element_type=jnp.float32)
            y = y + b2
            if relu_after_conv2:
                y = jnp.maximum(y, 0.0)

            # residual path (identity or 1x1 conv3 on the raw input tile)
            if use_conv3:
                res = jnp.dot(w3, xc, preferred_element_type=jnp.float32) + b3
            else:
                res = xc.astype(jnp.float32)

            o_ref[bi] = (y + res).astype(o_ref.dtype)

    return kernel


def residual_block_forward(x_ncl, params, *, kernel_size, dilation,
                           relu_after_conv2, l_tile=2048, b_tile=None):
    """x_ncl: (B, C_in, L) like PyTorch; params hold PyTorch-layout Conv1d weights."""
    K, d = kernel_size, dilation
    pad = d * (K - 1)
    has_halo = pad > 0
    w1, b1 = params["w1"], params["b1"]            # (F,    Cin, K), (F,)
    w2, b2 = params["w2"], params["b2"]            # (Cout, F,   K), (Cout,)
    use_conv3 = "w3" in params

    B, Cin, L = x_ncl.shape
    F = w1.shape[0]
    Cout = w2.shape[0]
    if not use_conv3:
        assert Cin == Cout

    # Time tile on the lane axis: multiple of 128 (and of the halo width Wh).
    Wh = _round_up(2 * pad, 128) if has_halo else 0
    TL = min(_round_up(l_tile, 128), _round_up(L, 128))
    if has_halo:
        TL = _round_up(max(TL, Wh), Wh)
        assert TL % Wh == 0 and Wh >= 2 * pad
    n_t = pl.cdiv(L, TL)

    Bt = b_tile if b_tile is not None else _pick_b_tile(B)
    assert B % Bt == 0

    cdt = jnp.bfloat16                      # HBM / MXU operand dtype
    x = x_ncl.astype(cdt)

    # Per-tap weights: (K, F, Cin) / (K, Cout, F); biases kept f32 for the epilogue.
    w1t = jnp.transpose(w1, (2, 0, 1)).astype(cdt)
    w2t = jnp.transpose(w2, (2, 0, 1)).astype(cdt)
    b1r = b1.reshape(F, 1).astype(jnp.float32)
    b2r = b2.reshape(Cout, 1).astype(jnp.float32)

    x_spec = pl.BlockSpec((Bt, Cin, TL), lambda b, t: (b, 0, t))
    full = lambda a: pl.BlockSpec(a.shape, lambda b, t: (0,) * a.ndim)

    args, in_specs = [x], [x_spec]
    if has_halo:
        r = TL // Wh
        # Narrow halo: only the tail Wh columns of the previous L-tile (clamped at t == 0,
        # fully masked to zero in-kernel on the first tile).
        args.append(x)
        in_specs.append(pl.BlockSpec(
            (Bt, Cin, Wh), lambda b, t: (b, 0, jnp.maximum(t * r - 1, 0))))
    args += [w1t, b1r, w2t, b2r]
    in_specs += [full(w1t), full(b1r), full(w2t), full(b2r)]

    flops = 2 * B * L * K * (Cin * F + F * Cout)
    if use_conv3:
        w3 = params["w3"][:, :, 0].astype(cdt)               # (Cout, Cin)
        b3r = params["b3"].reshape(Cout, 1).astype(jnp.float32)
        args += [w3, b3r]
        in_specs += [full(w3), full(b3r)]
        flops += 2 * B * L * Cin * Cout

    n_x_args = 2 if has_halo else 1
    weight_bytes = sum(int(a.size) * a.dtype.itemsize for a in args[n_x_args:])
    bytes_accessed = (int(x.size) * 2 + B * Cout * L * 2
                      + (B * int(n_t) * Cin * Wh * 2 if has_halo else 0)
                      + weight_bytes)

    kernel = _make_kernel(K, d, pad, Wh, relu_after_conv2, use_conv3, TL, Bt, has_halo)
    out = pl.pallas_call(
        kernel,
        out_shape=jax.ShapeDtypeStruct((B, Cout, L), cdt),
        grid=(B // Bt, n_t),
        in_specs=in_specs,
        out_specs=pl.BlockSpec((Bt, Cout, TL), lambda b, t: (b, 0, t)),
        compiler_params=pltpu.CompilerParams(
            dimension_semantics=("parallel", "parallel")),
        cost_estimate=pl.CostEstimate(flops=int(flops), transcendentals=0,
                                      bytes_accessed=int(bytes_accessed)),
    )(*args)
    return out


# ----------------------- pure-JAX reference for verification -----------------------

def _conv1d_ref(x, w, b, dilation):
    K = w.shape[-1]
    pad = dilation * (K - 1)
    y = jax.lax.conv_general_dilated(
        x, w, window_strides=(1,), padding=[(pad, 0)],
        rhs_dilation=(dilation,), dimension_numbers=("NCH", "OIH", "NCH"))
    return y + b[None, :, None]


def residual_block_ref(x, params, *, dilation, relu_after_conv2):
    h = jax.nn.relu(_conv1d_ref(x, params["w1"], params["b1"], dilation))
    y = _conv1d_ref(h, params["w2"], params["b2"], dilation)
    if relu_after_conv2:
        y = jax.nn.relu(y)
    res = _conv1d_ref(x, params["w3"], params["b3"], 1) if "w3" in params else x
    return y + res


# ----------------------------- parameter construction ------------------------------

def init_params(key, input_dim, num_filters, output_dim, kernel_size):
    ks = jax.random.split(key, 6)
    params = {
        "w1": jax.random.normal(ks[0], (num_filters, input_dim, kernel_size), jnp.float32) * 0.2,
        "b1": jax.random.normal(ks[1], (num_filters,), jnp.float32) * 0.1,
        "w2": jax.random.normal(ks[2], (output_dim, num_filters, kernel_size), jnp.float32) * 0.2,
        "b2": jax.random.normal(ks[3], (output_dim,), jnp.float32) * 0.1,
    }
    if input_dim != output_dim:  # conv3 exists only when channel counts differ
        params["w3"] = jax.random.normal(ks[4], (output_dim, input_dim, 1), jnp.float32) * 0.2
        params["b3"] = jax.random.normal(ks[5], (output_dim,), jnp.float32) * 0.1
    return params


def _bf16_round(a):
    return a.astype(jnp.bfloat16).astype(jnp.float32)


def run_case(key, *, num_filters, kernel_size, dilation_base, num_layers,
             nr_blocks_below, input_size, target_size, B, L,
             l_tile=2048, b_tile=None):
    input_dim = input_size if nr_blocks_below == 0 else num_filters
    output_dim = target_size if nr_blocks_below == num_layers - 1 else num_filters
    dilation = dilation_base ** nr_blocks_below
    relu_after_conv2 = nr_blocks_below < num_layers - 1

    kx, kp = jax.random.split(key)
    x = jax.random.normal(kx, (B, input_dim, L), jnp.float32)
    params = init_params(kp, input_dim, num_filters, output_dim, kernel_size)

    out = residual_block_forward(x, params, kernel_size=kernel_size,
                                 dilation=dilation,
                                 relu_after_conv2=relu_after_conv2,
                                 l_tile=l_tile, b_tile=b_tile)
    out = jax.block_until_ready(out)
    assert out.shape == (B, output_dim, L), out.shape

    # Reference on bf16-rounded inputs/weights (kernel computes with bf16 MXU operands).
    x_r = _bf16_round(x)
    params_r = {k: (_bf16_round(v) if k.startswith("w") else v) for k, v in params.items()}
    ref = residual_block_ref(x_r, params_r, dilation=dilation,
                             relu_after_conv2=relu_after_conv2)
    out_f32 = out.astype(jnp.float32)
    err = float(jnp.max(jnp.abs(out_f32 - ref)))
    assert jnp.allclose(out_f32, ref, atol=0.15, rtol=0.05), err
    return out


if __name__ == "__main__":
    key = jax.random.PRNGKey(0)
    k0, k1, k2, k3, k4, k5 = jax.random.split(key, 6)

    # Main case: last block of a 2-layer TCN -> dilation=2, 1x1 residual conv, no final ReLU.
    run_case(k0, num_filters=8, kernel_size=3, dilation_base=2, num_layers=2,
             nr_blocks_below=1, input_size=6, target_size=4, B=2, L=16)

    # First block: dilation=1, ReLU after conv2, 1x1 residual conv (input_size != num_filters).
    run_case(k1, num_filters=8, kernel_size=3, dilation_base=2, num_layers=3,
             nr_blocks_below=0, input_size=4, target_size=4, B=2, L=16)

    # Middle block: equal channels -> identity residual path (no conv3), dilation=2.
    run_case(k2, num_filters=8, kernel_size=3, dilation_base=2, num_layers=3,
             nr_blocks_below=1, input_size=4, target_size=4, B=2, L=16)

    # Multi-tile grid with ragged last tile (L=300, TL=128 -> 3 L-tiles): exercises the
    # narrow cross-tile halo and the in-kernel ragged-edge handling, with 1x1 residual conv.
    run_case(k3, num_filters=16, kernel_size=3, dilation_base=2, num_layers=2,
             nr_blocks_below=1, input_size=8, target_size=4, B=2, L=300, l_tile=128)

    # Multi-tile grid with identity residual + ReLU after conv2.
    run_case(k4, num_filters=16, kernel_size=3, dilation_base=2, num_layers=3,
             nr_blocks_below=1, input_size=8, target_size=8, B=2, L=300, l_tile=128)

    # Larger batch blocked per grid step (Bt=4), dilation=1 first block, ragged tiles.
    run_case(k5, num_filters=16, kernel_size=3, dilation_base=2, num_layers=2,
             nr_blocks_below=0, input_size=8, target_size=8, B=4, L=1000, l_tile=256)

    print("KERNEL_OK")
</pallas_src>

<mosaic_0001>
module attributes {stable_mosaic.version = 11 : i64} {
  func.func @kernel(%arg0: i32, %arg1: i32, %arg2: memref<2x8x128xbf16, #tpu.memory_space<vmem>>, %arg3: memref<2x8x128xbf16, #tpu.memory_space<vmem>>, %arg4: memref<3x8x8xbf16, #tpu.memory_space<vmem>>, %arg5: memref<8x1xf32, #tpu.memory_space<vmem>>, %arg6: memref<3x4x8xbf16, #tpu.memory_space<vmem>>, %arg7: memref<4x1xf32, #tpu.memory_space<vmem>>, %arg8: memref<4x8xbf16, #tpu.memory_space<vmem>>, %arg9: memref<4x1xf32, #tpu.memory_space<vmem>>, %arg10: memref<2x4x128xbf16, #tpu.memory_space<vmem>>) attributes {dimension_semantics = [#tpu.dimension_semantics<parallel>, #tpu.dimension_semantics<parallel>], iteration_bounds = array<i64: 1, 1>, scalar_prefetch = 0 : i64, scratch_operands = 0 : i64, tpu.core_type = #tpu.core_type<tc>, window_params = [{transform_indices = @transform_0, window_bounds = array<i64: 2, 8, 128>}, {transform_indices = @transform_1, window_bounds = array<i64: 2, 8, 128>}, {pipeline_mode = #tpu.pipeline_mode<synchronous>, transform_indices = @transform_2, window_bounds = array<i64: 3, 8, 8>}, {pipeline_mode = #tpu.pipeline_mode<synchronous>, transform_indices = @transform_3, window_bounds = array<i64: 8, 1>}, {pipeline_mode = #tpu.pipeline_mode<synchronous>, transform_indices = @transform_4, window_bounds = array<i64: 3, 4, 8>}, {pipeline_mode = #tpu.pipeline_mode<synchronous>, transform_indices = @transform_5, window_bounds = array<i64: 4, 1>}, {pipeline_mode = #tpu.pipeline_mode<synchronous>, transform_indices = @transform_6, window_bounds = array<i64: 4, 8>}, {pipeline_mode = #tpu.pipeline_mode<synchronous>, transform_indices = @transform_7, window_bounds = array<i64: 4, 1>}, {transform_indices = @transform_8, window_bounds = array<i64: 2, 4, 128>}]} {
    %c0 = arith.constant 0 : index
    %c0_0 = arith.constant 0 : index
    %c0_1 = arith.constant 0 : index
    %0 = vector.load %arg2[%c0, %c0_0, %c0_1] : memref<2x8x128xbf16, #tpu.memory_space<vmem>>, vector<2x8x128xbf16>
    %c0_2 = arith.constant 0 : index
    %c0_3 = arith.constant 0 : index
    %c0_4 = arith.constant 0 : index
    %1 = vector.load %arg3[%c0_2, %c0_3, %c0_4] : memref<2x8x128xbf16, #tpu.memory_space<vmem>>, vector<2x8x128xbf16>
    %c0_5 = arith.constant 0 : index
    %c0_6 = arith.constant 0 : index
    %c0_7 = arith.constant 0 : index
    %2 = vector.load %arg4[%c0_5, %c0_6, %c0_7] : memref<3x8x8xbf16, #tpu.memory_space<vmem>>, vector<3x8x8xbf16>
    %c0_8 = arith.constant 0 : index
    %c0_9 = arith.constant 0 : index
    %3 = vector.load %arg5[%c0_8, %c0_9] : memref<8x1xf32, #tpu.memory_space<vmem>>, vector<8x1xf32>
    %c0_10 = arith.constant 0 : index
    %c0_11 = arith.constant 0 : index
    %c0_12 = arith.constant 0 : index
    %4 = vector.load %arg6[%c0_10, %c0_11, %c0_12] : memref<3x4x8xbf16, #tpu.memory_space<vmem>>, vector<3x4x8xbf16>
    %c0_13 = arith.constant 0 : index
    %c0_14 = arith.constant 0 : index
    %5 = vector.load %arg7[%c0_13, %c0_14] : memref<4x1xf32, #tpu.memory_space<vmem>>, vector<4x1xf32>
    %c0_15 = arith.constant 0 : index
    %c0_16 = arith.constant 0 : index
    %6 = vector.load %arg8[%c0_15, %c0_16] : memref<4x8xbf16, #tpu.memory_space<vmem>>, vector<4x8xbf16>
    %c0_17 = arith.constant 0 : index
    %c0_18 = arith.constant 0 : index
    %7 = vector.load %arg9[%c0_17, %c0_18] : memref<4x1xf32, #tpu.memory_space<vmem>>, vector<4x1xf32>
    %c0_i32 = arith.constant 0 : i32
    %8 = arith.cmpi sgt, %arg1, %c0_i32 : i32
    %cst = arith.constant 0.000000e+00 : bf16
    %9 = vector.broadcast %cst : bf16 to vector<2x8x128xbf16>
    %10 = arith.select %8, %1, %9 : vector<2x8x128xbf16>
    %11 = vector.extract_strided_slice %0 {offsets = [0, 0, 0], sizes = [1, 8, 128], strides = [1, 1, 1]} : vector<2x8x128xbf16> to vector<1x8x128xbf16>
    %12 = vector.shape_cast %11 : vector<1x8x128xbf16> to vector<8x128xbf16>
    %13 = vector.extract_strided_slice %10 {offsets = [0, 0, 0], sizes = [1, 8, 128], strides = [1, 1, 1]} : vector<2x8x128xbf16> to vector<1x8x128xbf16>
    %14 = vector.shape_cast %13 : vector<1x8x128xbf16> to vector<8x128xbf16>
    %15 = tpu.concatenate %14, %12 in 1 : vector<8x128xbf16>, vector<8x128xbf16> -> vector<8x256xbf16>
    %16 = vector.extract_strided_slice %2 {offsets = [0, 0, 0], sizes = [1, 8, 8], strides = [1, 1, 1]} : vector<3x8x8xbf16> to vector<1x8x8xbf16>
    %17 = vector.shape_cast %16 : vector<1x8x8xbf16> to vector<8x8xbf16>
    %18 = vector.extract_strided_slice %15 {offsets = [0, 120], sizes = [8, 132], strides = [1, 1]} : vector<8x256xbf16> to vector<8x132xbf16>
    %cst_19 = arith.constant dense<0.000000e+00> : vector<8x132xf32>
    %19 = tpu.matmul %17, %18, %cst_19 {dimension_numbers = #tpu.dot_dimension_numbers<[1], [0], [0], [1], [0, 0, 1, 1], [], []>} : vector<8x8xbf16>, vector<8x132xbf16>, vector<8x132xf32> -> vector<8x132xf32>
    %20 = vector.extract_strided_slice %2 {offsets = [1, 0, 0], sizes = [1, 8, 8], strides = [1, 1, 1]} : vector<3x8x8xbf16> to vector<1x8x8xbf16>
    %21 = vector.shape_cast %20 : vector<1x8x8xbf16> to vector<8x8xbf16>
    %22 = vector.extract_strided_slice %15 {offsets = [0, 122], sizes = [8, 132], strides = [1, 1]} : vector<8x256xbf16> to vector<8x132xbf16>
    %cst_20 = arith.constant dense<0.000000e+00> : vector<8x132xf32>
    %23 = tpu.matmul %21, %22, %cst_20 {dimension_numbers = #tpu.dot_dimension_numbers<[1], [0], [0], [1], [0, 0, 1, 1], [], []>} : vector<8x8xbf16>, vector<8x132xbf16>, vector<8x132xf32> -> vector<8x132xf32>
    %24 = arith.addf %19, %23 : vector<8x132xf32>
    %25 = vector.extract_strided_slice %2 {offsets = [2, 0, 0], sizes = [1, 8, 8], strides = [1, 1, 1]} : vector<3x8x8xbf16> to vector<1x8x8xbf16>
    %26 = vector.shape_cast %25 : vector<1x8x8xbf16> to vector<8x8xbf16>
    %27 = vector.extract_strided_slice %15 {offsets = [0, 124], sizes = [8, 132], strides = [1, 1]} : vector<8x256xbf16> to vector<8x132xbf16>
    %cst_21 = arith.constant dense<0.000000e+00> : vector<8x132xf32>
    %28 = tpu.matmul %26, %27, %cst_21 {dimension_numbers = #tpu.dot_dimension_numbers<[1], [0], [0], [1], [0, 0, 1, 1], [], []>} : vector<8x8xbf16>, vector<8x132xbf16>, vector<8x132xf32> -> vector<8x132xf32>
    %29 = arith.addf %24, %28 : vector<8x132xf32>
    %30 = vector.broadcast %3 : vector<8x1xf32> to vector<8x132xf32>
    %31 = arith.addf %29, %30 : vector<8x132xf32>
    %cst_22 = arith.constant 0.000000e+00 : f32
    %32 = vector.broadcast %cst_22 : f32 to vector<8x132xf32>
    %33 = arith.maximumf %31, %32 : vector<8x132xf32>
    %34 = tpu.iota {dimensions = array<i32: 1>} : vector<8x132xi32>
    %c0_i32_23 = arith.constant 0 : i32
    %35 = arith.cmpi sgt, %arg1, %c0_i32_23 : i32
    %c4_i32 = arith.constant 4 : i32
    %36 = vector.broadcast %c4_i32 : i32 to vector<8x132xi32>
    %37 = arith.cmpi sge, %34, %36 : vector<8x132xi32>
    %38 = vector.broadcast %35 : i1 to vector<8x132xi1>
    %39 = arith.ori %38, %37 : vector<8x132xi1>
    %cst_24 = arith.constant 0.000000e+00 : f32
    %40 = vector.broadcast %cst_24 : f32 to vector<8x132xf32>
    %41 = arith.select %39, %33, %40 : vector<8x132xi1>, vector<8x132xf32>
    %42 = arith.truncf %41 : vector<8x132xf32> to vector<8x132xbf16>
    %43 = vector.extract_strided_slice %4 {offsets = [0, 0, 0], sizes = [1, 4, 8], strides = [1, 1, 1]} : vector<3x4x8xbf16> to vector<1x4x8xbf16>
    %44 = vector.shape_cast %43 : vector<1x4x8xbf16> to vector<4x8xbf16>
    %45 = vector.extract_strided_slice %42 {offsets = [0, 0], sizes = [8, 128], strides = [1, 1]} : vector<8x132xbf16> to vector<8x128xbf16>
    %cst_25 = arith.constant dense<0.000000e+00> : vector<4x128xf32>
    %46 = tpu.matmul %44, %45, %cst_25 {dimension_numbers = #tpu.dot_dimension_numbers<[1], [0], [0], [1], [0, 0, 1, 1], [], []>} : vector<4x8xbf16>, vector<8x128xbf16>, vector<4x128xf32> -> vector<4x128xf32>
    %47 = vector.extract_strided_slice %4 {offsets = [1, 0, 0], sizes = [1, 4, 8], strides = [1, 1, 1]} : vector<3x4x8xbf16> to vector<1x4x8xbf16>
    %48 = vector.shape_cast %47 : vector<1x4x8xbf16> to vector<4x8xbf16>
    %49 = vector.extract_strided_slice %42 {offsets = [0, 2], sizes = [8, 128], strides = [1, 1]} : vector<8x132xbf16> to vector<8x128xbf16>
    %cst_26 = arith.constant dense<0.000000e+00> : vector<4x128xf32>
    %50 = tpu.matmul %48, %49, %cst_26 {dimension_numbers = #tpu.dot_dimension_numbers<[1], [0], [0], [1], [0, 0, 1, 1], [], []>} : vector<4x8xbf16>, vector<8x128xbf16>, vector<4x128xf32> -> vector<4x128xf32>
    %51 = arith.addf %46, %50 : vector<4x128xf32>
    %52 = vector.extract_strided_slice %4 {offsets = [2, 0, 0], sizes = [1, 4, 8], strides = [1, 1, 1]} : vector<3x4x8xbf16> to vector<1x4x8xbf16>
    %53 = vector.shape_cast %52 : vector<1x4x8xbf16> to vector<4x8xbf16>
    %54 = vector.extract_strided_slice %42 {offsets = [0, 4], sizes = [8, 128], strides = [1, 1]} : vector<8x132xbf16> to vector<8x128xbf16>
    %cst_27 = arith.constant dense<0.000000e+00> : vector<4x128xf32>
    %55 = tpu.matmul %53, %54, %cst_27 {dimension_numbers = #tpu.dot_dimension_numbers<[1], [0], [0], [1], [0, 0, 1, 1], [], []>} : vector<4x8xbf16>, vector<8x128xbf16>, vector<4x128xf32> -> vector<4x128xf32>
    %56 = arith.addf %51, %55 : vector<4x128xf32>
    %57 = vector.broadcast %5 : vector<4x1xf32> to vector<4x128xf32>
    %58 = arith.addf %56, %57 : vector<4x128xf32>
    %cst_28 = arith.constant dense<0.000000e+00> : vector<4x128xf32>
    %59 = tpu.matmul %6, %12, %cst_28 {dimension_numbers = #tpu.dot_dimension_numbers<[1], [0], [0], [1], [0, 0, 1, 1], [], []>} : vector<4x8xbf16>, vector<8x128xbf16>, vector<4x128xf32> -> vector<4x128xf32>
    %60 = vector.broadcast %7 : vector<4x1xf32> to vector<4x128xf32>
    %61 = arith.addf %59, %60 : vector<4x128xf32>
    %62 = arith.addf %58, %61 : vector<4x128xf32>
    %63 = arith.truncf %62 : vector<4x128xf32> to vector<4x128xbf16>
    %c0_29 = arith.constant 0 : index
    %c0_30 = arith.constant 0 : index
    %c0_31 = arith.constant 0 : index
    %64 = vector.load %arg10[%c0_29, %c0_30, %c0_31] : memref<2x4x128xbf16, #tpu.memory_space<vmem>>, vector<1x4x128xbf16>
    %65 = vector.shape_cast %64 : vector<1x4x128xbf16> to vector<4x128xbf16>
    %66 = vector.shape_cast %63 : vector<4x128xbf16> to vector<1x4x128xbf16>
    tpu.vector_store %arg10[%c0_29, %c0_30, %c0_31], %66 {strides = array<i32>} : memref<2x4x128xbf16, #tpu.memory_space<vmem>>, vector<1x4x128xbf16>,
    %67 = vector.extract_strided_slice %0 {offsets = [1, 0, 0], sizes = [1, 8, 128], strides = [1, 1, 1]} : vector<2x8x128xbf16> to vector<1x8x128xbf16>
    %68 = vector.shape_cast %67 : vector<1x8x128xbf16> to vector<8x128xbf16>
    %69 = vector.extract_strided_slice %10 {offsets = [1, 0, 0], sizes = [1, 8, 128], strides = [1, 1, 1]} : vector<2x8x128xbf16> to vector<1x8x128xbf16>
    %70 = vector.shape_cast %69 : vector<1x8x128xbf16> to vector<8x128xbf16>
    %71 = tpu.concatenate %70, %68 in 1 : vector<8x128xbf16>, vector<8x128xbf16> -> vector<8x256xbf16>
    %72 = vector.extract_strided_slice %2 {offsets = [0, 0, 0], sizes = [1, 8, 8], strides = [1, 1, 1]} : vector<3x8x8xbf16> to vector<1x8x8xbf16>
    %73 = vector.shape_cast %72 : vector<1x8x8xbf16> to vector<8x8xbf16>
    %74 = vector.extract_strided_slice %71 {offsets = [0, 120], sizes = [8, 132], strides = [1, 1]} : vector<8x256xbf16> to vector<8x132xbf16>
    %cst_32 = arith.constant dense<0.000000e+00> : vector<8x132xf32>
    %75 = tpu.matmul %73, %74, %cst_32 {dimension_numbers = #tpu.dot_dimension_numbers<[1], [0], [0], [1], [0, 0, 1, 1], [], []>} : vector<8x8xbf16>, vector<8x132xbf16>, vector<8x132xf32> -> vector<8x132xf32>
    %76 = vector.extract_strided_slice %2 {offsets = [1, 0, 0], sizes = [1, 8, 8], strides = [1, 1, 1]} : vector<3x8x8xbf16> to vector<1x8x8xbf16>
    %77 = vector.shape_cast %76 : vector<1x8x8xbf16> to vector<8x8xbf16>
    %78 = vector.extract_strided_slice %71 {offsets = [0, 122], sizes = [8, 132], strides = [1, 1]} : vector<8x256xbf16> to vector<8x132xbf16>
    %cst_33 = arith.constant dense<0.000000e+00> : vector<8x132xf32>
    %79 = tpu.matmul %77, %78, %cst_33 {dimension_numbers = #tpu.dot_dimension_numbers<[1], [0], [0], [1], [0, 0, 1, 1], [], []>} : vector<8x8xbf16>, vector<8x132xbf16>, vector<8x132xf32> -> vector<8x132xf32>
    %80 = arith.addf %75, %79 : vector<8x132xf32>
    %81 = vector.extract_strided_slice %2 {offsets = [2, 0, 0], sizes = [1, 8, 8], strides = [1, 1, 1]} : vector<3x8x8xbf16> to vector<1x8x8xbf16>
    %82 = vector.shape_cast %81 : vector<1x8x8xbf16> to vector<8x8xbf16>
    %83 = vector.extract_strided_slice %71 {offsets = [0, 124], sizes = [8, 132], strides = [1, 1]} : vector<8x256xbf16> to vector<8x132xbf16>
    %cst_34 = arith.constant dense<0.000000e+00> : vector<8x132xf32>
    %84 = tpu.matmul %82, %83, %cst_34 {dimension_numbers = #tpu.dot_dimension_numbers<[1], [0], [0], [1], [0, 0, 1, 1], [], []>} : vector<8x8xbf16>, vector<8x132xbf16>, vector<8x132xf32> -> vector<8x132xf32>
    %85 = arith.addf %80, %84 : vector<8x132xf32>
    %86 = vector.broadcast %3 : vector<8x1xf32> to vector<8x132xf32>
    %87 = arith.addf %85, %86 : vector<8x132xf32>
    %cst_35 = arith.constant 0.000000e+00 : f32
    %88 = vector.broadcast %cst_35 : f32 to vector<8x132xf32>
    %89 = arith.maximumf %87, %88 : vector<8x132xf32>
    %90 = tpu.iota {dimensions = array<i32: 1>} : vector<8x132xi32>
    %c0_i32_36 = arith.constant 0 : i32
    %91 = arith.cmpi sgt, %arg1, %c0_i32_36 : i32
    %c4_i32_37 = arith.constant 4 : i32
    %92 = vector.broadcast %c4_i32_37 : i32 to vector<8x132xi32>
    %93 = arith.cmpi sge, %90, %92 : vector<8x132xi32>
    %94 = vector.broadcast %91 : i1 to vector<8x132xi1>
    %95 = arith.ori %94, %93 : vector<8x132xi1>
    %cst_38 = arith.constant 0.000000e+00 : f32
    %96 = vector.broadcast %cst_38 : f32 to vector<8x132xf32>
    %97 = arith.select %95, %89, %96 : vector<8x132xi1>, vector<8x132xf32>
    %98 = arith.truncf %97 : vector<8x132xf32> to vector<8x132xbf16>
    %99 = vector.extract_strided_slice %4 {offsets = [0, 0, 0], sizes = [1, 4, 8], strides = [1, 1, 1]} : vector<3x4x8xbf16> to vector<1x4x8xbf16>
    %100 = vector.shape_cast %99 : vector<1x4x8xbf16> to vector<4x8xbf16>
    %101 = vector.extract_strided_slice %98 {offsets = [0, 0], sizes = [8, 128], strides = [1, 1]} : vector<8x132xbf16> to vector<8x128xbf16>
    %cst_39 = arith.constant dense<0.000000e+00> : vector<4x128xf32>
    %102 = tpu.matmul %100, %101, %cst_39 {dimension_numbers = #tpu.dot_dimension_numbers<[1], [0], [0], [1], [0, 0, 1, 1], [], []>} : vector<4x8xbf16>, vector<8x128xbf16>, vector<4x128xf32> -> vector<4x128xf32>
    %103 = vector.extract_strided_slice %4 {offsets = [1, 0, 0], sizes = [1, 4, 8], strides = [1, 1, 1]} : vector<3x4x8xbf16> to vector<1x4x8xbf16>
    %104 = vector.shape_cast %103 : vector<1x4x8xbf16> to vector<4x8xbf16>
    %105 = vector.extract_strided_slice %98 {offsets = [0, 2], sizes = [8, 128], strides = [1, 1]} : vector<8x132xbf16> to vector<8x128xbf16>
    %cst_40 = arith.constant dense<0.000000e+00> : vector<4x128xf32>
    %106 = tpu.matmul %104, %105, %cst_40 {dimension_numbers = #tpu.dot_dimension_numbers<[1], [0], [0], [1], [0, 0, 1, 1], [], []>} : vector<4x8xbf16>, vector<8x128xbf16>, vector<4x128xf32> -> vector<4x128xf32>
    %107 = arith.addf %102, %106 : vector<4x128xf32>
    %108 = vector.extract_strided_slice %4 {offsets = [2, 0, 0], sizes = [1, 4, 8], strides = [1, 1, 1]} : vector<3x4x8xbf16> to vector<1x4x8xbf16>
    %109 = vector.shape_cast %108 : vector<1x4x8xbf16> to vector<4x8xbf16>
    %110 = vector.extract_strided_slice %98 {offsets = [0, 4], sizes = [8, 128], strides = [1, 1]} : vector<8x132xbf16> to vector<8x128xbf16>
    %cst_41 = arith.constant dense<0.000000e+00> : vector<4x128xf32>
    %111 = tpu.matmul %109, %110, %cst_41 {dimension_numbers = #tpu.dot_dimension_numbers<[1], [0], [0], [1], [0, 0, 1, 1], [], []>} : vector<4x8xbf16>, vector<8x128xbf16>, vector<4x128xf32> -> vector<4x128xf32>
    %112 = arith.addf %107, %111 : vector<4x128xf32>
    %113 = vector.broadcast %5 : vector<4x1xf32> to vector<4x128xf32>
    %114 = arith.addf %112, %113 : vector<4x128xf32>
    %cst_42 = arith.constant dense<0.000000e+00> : vector<4x128xf32>
    %115 = tpu.matmul %6, %68, %cst_42 {dimension_numbers = #tpu.dot_dimension_numbers<[1], [0], [0], [1], [0, 0, 1, 1], [], []>} : vector<4x8xbf16>, vector<8x128xbf16>, vector<4x128xf32> -> vector<4x128xf32>
    %116 = vector.broadcast %7 : vector<4x1xf32> to vector<4x128xf32>
    %117 = arith.addf %115, %116 : vector<4x128xf32>
    %118 = arith.addf %114, %117 : vector<4x128xf32>
    %119 = arith.truncf %118 : vector<4x128xf32> to vector<4x128xbf16>
    %c1 = arith.constant 1 : index
    %c0_43 = arith.constant 0 : index
    %c0_44 = arith.constant 0 : index
    %120 = vector.load %arg10[%c1, %c0_43, %c0_44] : memref<2x4x128xbf16, #tpu.memory_space<vmem>>, vector<1x4x128xbf16>
    %121 = vector.shape_cast %120 : vector<1x4x128xbf16> to vector<4x128xbf16>
    %122 = vector.shape_cast %119 : vector<4x128xbf16> to vector<1x4x128xbf16>
    tpu.vector_store %arg10[%c1, %c0_43, %c0_44], %122 {strides = array<i32>} : memref<2x4x128xbf16, #tpu.memory_space<vmem>>, vector<1x4x128xbf16>,
    return
  }
  func.func @transform_0(%arg0: i32, %arg1: i32) -> (i32, i32, i32) {
    %c0_i32 = arith.constant 0 : i32
    %c0_i32_0 = arith.constant 0 : i32
    return %arg0, %c0_i32, %arg1 : i32, i32, i32
  }
  func.func @transform_1(%arg0: i32, %arg1: i32) -> (i32, i32, i32) {
    %c1_i32 = arith.constant 1 : i32
    %0 = arith.muli %arg1, %c1_i32 : i32
    %c1_i32_0 = arith.constant 1 : i32
    %1 = arith.subi %0, %c1_i32_0 : i32
    %c0_i32 = arith.constant 0 : i32
    %2 = arith.maxsi %1, %c0_i32 : i32
    %c0_i32_1 = arith.constant 0 : i32
    %c0_i32_2 = arith.constant 0 : i32
    return %arg0, %c0_i32_1, %2 : i32, i32, i32
  }
  func.func @transform_2(%arg0: i32, %arg1: i32) -> (i32, i32, i32) {
    %c0_i32 = arith.constant 0 : i32
    %c0_i32_0 = arith.constant 0 : i32
    %c0_i32_1 = arith.constant 0 : i32
    %c0_i32_2 = arith.constant 0 : i32
    return %c0_i32, %c0_i32_0, %c0_i32_1 : i32, i32, i32
  }
  func.func @transform_3(%arg0: i32, %arg1: i32) -> (i32, i32) {
    %c0_i32 = arith.constant 0 : i32
    %c0_i32_0 = arith.constant 0 : i32
    %c0_i32_1 = arith.constant 0 : i32
    return %c0_i32, %c0_i32_0 : i32, i32
  }
  func.func @transform_4(%arg0: i32, %arg1: i32) -> (i32, i32, i32) {
    %c0_i32 = arith.constant 0 : i32
    %c0_i32_0 = arith.constant 0 : i32
    %c0_i32_1 = arith.constant 0 : i32
    %c0_i32_2 = arith.constant 0 : i32
    return %c0_i32, %c0_i32_0, %c0_i32_1 : i32, i32, i32
  }
  func.func @transform_5(%arg0: i32, %arg1: i32) -> (i32, i32) {
    %c0_i32 = arith.constant 0 : i32
    %c0_i32_0 = arith.constant 0 : i32
    %c0_i32_1 = arith.constant 0 : i32
    return %c0_i32, %c0_i32_0 : i32, i32
  }
  func.func @transform_6(%arg0: i32, %arg1: i32) -> (i32, i32) {
    %c0_i32 = arith.constant 0 : i32
    %c0_i32_0 = arith.constant 0 : i32
    %c0_i32_1 = arith.constant 0 : i32
    return %c0_i32, %c0_i32_0 : i32, i32
  }
  func.func @transform_7(%arg0: i32, %arg1: i32) -> (i32, i32) {
    %c0_i32 = arith.constant 0 : i32
    %c0_i32_0 = arith.constant 0 : i32
    %c0_i32_1 = arith.constant 0 : i32
    return %c0_i32, %c0_i32_0 : i32, i32
  }
  func.func @transform_8(%arg0: i32, %arg1: i32) -> (i32, i32, i32) {
    %c0_i32 = arith.constant 0 : i32
    %c0_i32_0 = arith.constant 0 : i32
    return %arg0, %c0_i32, %arg1 : i32, i32, i32
  }
}

</mosaic_0001>

<bundles_post_ra>
// kernel: tpu_custom_call.1
= control target key start
LH: loop header
LB: loop body
LE: loop exit
PB: predicated region body
PF: predicated region fallthrough
CT: control target
= control target key end

     0   :  { %13 = vsyncpa [#allocation3], 0  ;;  %s1259_s0 = inlined_call_operand.vmem [shape: bf16[2,8,16], index: 0, kind: input, shape index: {}]   ;;  %s1260_s1 = inlined_call_operand.hbm [shape: bf16[2,8,16], index: 1, kind: input, shape index: {}]   ;;  %s1261_s2 = inlined_call_operand.vmem [shape: bf16[3,8,8], index: 2, kind: input, shape index: {}]   ;;  %s1262_s3 = inlined_call_operand.vmem [shape: f32[8,1], index: 3, kind: input, shape index: {}]   ;;  %s1263_s4 = inlined_call_operand.vmem [shape: bf16[3,4,8], index: 4, kind: input, shape index: {}]   ;;  %s1264_s5 = inlined_call_operand.vmem [shape: f32[4,1], index: 5, kind: input, shape index: {}]   ;;  %s1265_s6 = inlined_call_operand.vmem [shape: bf16[4,8], index: 6, kind: input, shape index: {}]   ;;  %s1266_s7 = inlined_call_operand.vmem [shape: f32[4,1], index: 7, kind: input, shape index: {}]   ;;  %s1267_s8 = inlined_call_operand.hbm [shape: bf16[2,4,16], index: 8, kind: output, shape index: {}]  }
   0x1   :  { %14 = vsyncpa [#allocation4], 0  ;;  %s1000_s27 = smov [#allocation2]  }
   0x2   :  { %s27_s28 = sshll.u32 %s1000_s27, 4  ;;  %s28_s28 = int_to_ptr.vmem [resolvable:$true] %s27_s28 }
   0x3   :  { %s964_s29 = scalar_lea.vmem %s28_s28, 128  ;;  %p969_p1 = scmp.lt.s32.totalorder %s28_s28, %s28_s28 }
   0x4   :  { %p965_p0 = scmp.ne.s32.totalorder %s28_s28, %s964_s29  ;;  %p970_p2 = scmp.lt.s32.totalorder %s964_s29, %s964_s29 }
   0x6   :  { %p971_p3 = por %p970_p2, %p969_p1 }
   0x8   :  { %p972_p4 = pnand %p971_p3, %p965_p0 }
   0xa   :  { %975 = shalt.err (!%p972_p4)
}
   0xb   :  { %s1001_s30 = smov 64   ;;  %s1002_s9 = smov 4  }
   0xc   :  { %33 = dma.hbm_to_vmem [thread:$0]  %s1260_s1, 128, %s28_s28, [#allocation3], %s1001_s30, %s1001_s30, %s1002_s9  }
   0xd   :  { %996 = dma.done.wait [#allocation3], 128  }
   0xe   :  { %997 = vsyncadd [#allocation3], 4294967168  ;;  %v1003_v0 = vmov 0   ;;  %s1004_s12 = smov 8   ;;  %s1005_s13 = smov 6   ;;  %v60_v2 = vld [vmem:[%s1262_s3] sm:$0xff]  ;;  %v256_v25 = vlaneseq }
   0xf   :  { %133 = vrot.lane.b32.xlu1 %v1003_v0, %s1004_s12  ;;  %75 = vrot.lane.b32.xlu0 %v1003_v0, %s1005_s13  ;;  %v1073_v1 = vld [vmem:[%s1259_s0] sm:$0xf]  ;;  %vm85_vm0 = vcmask 1043456   ;;  %vm79_vm1 = vcmask 48128   ;;  %vm81_vm2 = vcmask 64512   ;;  %vm193_vm3 = vcmask 31744  }
  0x10   :  { %124 = vmatprep.mubr.bf16.mxu0 %v1003_v0  ;;  %180 = vmatprep.mubr.bf16.mxu1 %v1003_v0  ;;  %v1095_v11 = vld [vmem:[%s1261_s2 + $0x4] sm:$0xf]  ;;  %v1100_v12 = vld [vmem:[%s1261_s2] sm:$0xf]  ;;  %v1113_v17 = vld [vmem:[%s1261_s2 + $0x8] sm:$0xf] }
  0x11   :  { %954 = vset.pattern.permute.xlu0 %v1003_v0  ;;  %955 = vset.pattern.permute.xlu1 %v1003_v0  ;;  %v1006_v18 = vmov 0.0   ;;  %v1121_v31 = vand.u32 127, %v256_v25  ;;  %vm1007_vm5 = vmmov 0   ;;  %s1008_s2 = smov 124   ;;  %s1009_s22 = smov 126   ;;  %v435_v47 = vsel %vm85_vm0, %v1073_v1, 0 }
  0x12   :  { %v1138_v46 = vld [vmem:[%s1263_s4] sm:$0x3]  ;;  %v1156_v48 = vld [vmem:[%s1259_s0 + $0x4] sm:$0xf]  ;;  %vm273_vm6 = vcmask 1031168   ;;  %vm371_vm7 = vcmask 1014784  }
  0x13   :  { %135 = vrot.lane.b32.xlu1 %v1073_v1, %s1004_s12  ;;  %77 = vrot.lane.b32.xlu0 %v1073_v1, %s1005_s13  ;;  %vm259_vm4 = vcmp.ge.s32.totalorder %v1121_v31, 4  ;;  %v1161_v49 = vld [vmem:[%s1265_s6] sm:$0x3]  ;;  %v1179_v55 = vld [vmem:[%s1263_s4 + $0x2] sm:$0x3] }
  0x14   :  { %v1193_v63 = vld [vmem:[%s1263_s4 + $0x4] sm:$0x3]  ;;  %v66_v31 = vld [vmem:[%s1266_s7] sm:$0xf] }
  0x17   :  { %191 = vrot.lane.b32.xlu1 %v1073_v1, %s1002_s9  ;;  %189 = vrot.lane.b32.xlu0 %v1003_v0, %s1002_s9 }
  0x1b   :  { %249 = vperm.xlu0 %954, %v60_v2  }
  0x81   :  { %v134_v3 = vpop.permute.xlu1 %133  ;;  %v76_v4 = vpop.permute.xlu0 %75 }
  0x85   :  { %v136_v5 = vpop.permute.xlu1 %135  ;;  %v78_v6 = vpop.permute.xlu0 %77 }
  0x86   :  { %857 = vmatprep.subr.msk.bf16.mxu0 %vm85_vm0, %v78_v6  ;;  %859 = vmatprep.subr.msk.bf16.mxu1 %vm85_vm0, %v136_v5  ;;  %v80_v7 = vsel %vm79_vm1, %v76_v4, %v78_v6  ;;  %v138_v8 = vsel %vm81_vm2, %v134_v3, %v136_v5 }
  0x87   :  { %v87_v9 = vsel %vm85_vm0, %v80_v7, 0  ;;  %v143_v10 = vsel %vm85_vm0, %v138_v8, 0 }
  0x88   :  { %107 = vmatpush1.bf16.msra.mxu0 %v87_v9  ;;  %163 = vmatpush1.bf16.msra.mxu1 %v143_v10 }
  0x89   :  { %v192_v13 = vpop.permute.xlu1 %191  ;;  %v190_v14 = vpop.permute.xlu0 %189  ;;  %893 = vmatprep.subr.bf16.mxu1 %v1006_v18 }
  0x8a   :  { %v194_v15 = vsel %vm193_vm3, %v190_v14, %v192_v13  ;;  %861 = vmatprep.subr.msk.bf16.mxu0 %vm85_vm0, %v192_v13 }
  0x8b   :  { %858 = vmatmul.mubr.msk.bf16.vlgmr.msra.gmra.mxu0 %vm81_vm2, %v1095_v11  ;;  %860 = vmatmul.mubr.msk.bf16.vlgmr.msra.gmra.mxu1 %vm81_vm2, %v1100_v12  ;;  %v199_v16 = vsel %vm85_vm0, %v194_v15, 0 }
  0x8c   :  { %219 = vmatpush1.bf16.msra.mxu0 %v199_v16  ;;  %236 = vmatprep.mubr.bf16.mxu0 %v1003_v0 }
  0x8d   :  { %899 = vmatprep.subr.bf16.mxu0 %v1006_v18  ;;  %895 = vmatprep.mubr.msk.bf16.mxu1 %vm1007_vm5, %v1006_v18 }
  0x93   :  { %862 = vmatmul.mubr.msk.bf16.vlgmr.msra.gmra.mxu0 %vm81_vm2, %v1113_v17 }
  0x94   :  { %901 = vmatprep.mubr.msk.bf16.mxu0 %vm1007_vm5, %v1006_v18 }
  0x96   :  { %v1119_v30 = vpop.permute.xlu0 %249 }
 0x14b   :  { %v126_v19 = vpop.f32.mrf.mxu0  ;;  %v182_v20 = vpop.f32.mrf.mxu1 }
 0x14c   :  { %v183_v28 = vadd.f32 %v182_v20, %v126_v19 }
 0x14d   :  { %v128_v21 = vpop.f32.mrf.mxu0  ;;  %v184_v22 = vpop.f32.mrf.mxu1 }
 0x14e   :  { %v185_v32 = vadd.f32 %v184_v22, %v128_v21 }
 0x14f   :  { %v130_v23 = vpop.f32.mrf.mxu0  ;;  %v186_v24 = vpop.f32.mrf.mxu1 }
 0x151   :  { %v131_v26 = vpop.f32.mrf.mxu0  ;;  %v187_v27 = vpop.f32.mrf.mxu1 }
 0x153   :  { %v238_v29 = vpop.f32.mrf.mxu0 }
 0x154   :  { %v245_v33 = vadd.f32 %v238_v29, %v183_v28 }
 0x155   :  { %v240_v34 = vpop.f32.mrf.mxu0 }
 0x156   :  { %v246_v35 = vadd.f32 %v240_v34, %v185_v32  ;;  %v252_v36 = vadd.f32 %v1119_v30, %v245_v33 }
 0x157   :  { %v242_v37 = vpop.f32.mrf.mxu0 }
 0x158   :  { %v254_v38 = vmax.f32 %v252_v36, 0.0  ;;  %v253_v39 = vadd.f32 %v1119_v30, %v246_v35 }
 0x159   :  { %v243_v40 = vpop.f32.mrf.mxu0 }
 0x15a   :  { %v263_v41 = vsel %vm259_vm4, %v254_v38, 0.0  ;;  %v255_v43 = vmax.f32 %v253_v39, 0.0 }
 0x15b   :  { %v265_v42 = vpack.c.bf16 %v263_v41, %v263_v41 }
 0x15c   :  { %v266_v45 = vpack.c.bf16 %v255_v43, %v255_v43 }
 0x15d   :  { %367 = vrot.lane.b32.xlu0 %v265_v42, %s1008_s2  ;;  %269 = vrot.lane.b32.xlu1 %v265_v42, %s1009_s22  ;;  %v325_v44 = vsel %vm85_vm0, %v265_v42, 0 }
 0x15e   :  { %900 = vmatpush3.bf16.msra.mxu0 %v325_v44 }
 0x15f   :  { %911 = vmatprep.subr.bf16.mxu0 %v1006_v18 }
 0x161   :  { %271 = vrot.lane.b32.xlu1 %v266_v45, %s1009_s22  ;;  %482 = vrot.lane.b32.xlu0 %v1003_v0, %s1005_s13 }
 0x162   :  { %902 = vmatmul.mubr.msk.bf16.vlgmr.msra.gmra.mxu0 %vm81_vm2, %v1138_v46 }
 0x163   :  { %912 = vmatpush3.bf16.msra.mxu0 %v435_v47  ;;  %913 = vmatprep.mubr.msk.bf16.mxu0 %vm1007_vm5, %v1006_v18 }
 0x165   :  { %369 = vrot.lane.b32.xlu1 %v266_v45, %s1008_s2  ;;  %534 = vrot.lane.b32.xlu0 %v1003_v0, %s1004_s12 }
 0x169   :  { %484 = vrot.lane.b32.xlu1 %v1156_v48, %s1005_s13  ;;  %586 = vrot.lane.b32.xlu0 %v1003_v0, %s1002_s9 }
 0x16a   :  { %914 = vmatmul.mubr.msk.bf16.vlgmr.msra.gmra.mxu0 %vm81_vm2, %v1161_v49 }
 0x16b   :  { %577 = vmatprep.mubr.bf16.mxu0 %v1003_v0 }
 0x16d   :  { %536 = vrot.lane.b32.xlu1 %v1156_v48, %s1004_s12 }
 0x171   :  { %588 = vrot.lane.b32.xlu1 %v1156_v48, %s1002_s9 }
 0x1cf   :  { %v270_v50 = vpop.permute.xlu1 %269  ;;  %v368_v51 = vpop.permute.xlu0 %367 }
 0x1d3   :  { %v272_v52 = vpop.permute.xlu1 %271  ;;  %v483_v57 = vpop.permute.xlu0 %482 }
 0x1d4   :  { %v274_v53 = vsel %vm273_vm6, %v270_v50, %v272_v52 }
 0x1d5   :  { %v279_v54 = vsel %vm85_vm0, %v274_v53, 0 }
 0x1d6   :  { %894 = vmatpush3.bf16.msra.mxu1 %v279_v54 }
 0x1d7   :  { %v370_v56 = vpop.permute.xlu1 %369  ;;  %905 = vmatprep.subr.bf16.mxu1 %v1006_v18  ;;  %v535_v62 = vpop.permute.xlu0 %534 }
 0x1d8   :  { %v372_v58 = vsel %vm371_vm7, %v368_v51, %v370_v56 }
 0x1d9   :  { %v377_v59 = vsel %vm85_vm0, %v372_v58, 0  ;;  %896 = vmatmul.mubr.msk.bf16.vlgmr.msra.gmra.mxu1 %vm81_vm2, %v1179_v55 }
 0x1da   :  { %906 = vmatpush3.bf16.msra.mxu1 %v377_v59  ;;  %907 = vmatprep.mubr.msk.bf16.mxu1 %vm1007_vm5, %v1006_v18 }
 0x1db   :  { %v485_v60 = vpop.permute.xlu1 %484  ;;  %v587_v5 = vpop.permute.xlu0 %586 }
 0x1dc   :  { %v486_v61 = vsel %vm79_vm1, %v483_v57, %v485_v60  ;;  %867 = vmatprep.subr.msk.bf16.mxu1 %vm85_vm0, %v485_v60  ;;  %v792_v57 = vsel %vm85_vm0, %v1156_v48, 0 }
 0x1dd   :  { %v488_v1 = vsel %vm85_vm0, %v486_v61, 0 }
 0x1df   :  { %v537_v2 = vpop.permute.xlu1 %536 }
 0x1e0   :  { %v538_v3 = vsel %vm81_vm2, %v535_v62, %v537_v2  ;;  %869 = vmatprep.subr.msk.bf16.mxu0 %vm85_vm0, %v537_v2 }
 0x1e1   :  { %908 = vmatmul.mubr.msk.bf16.vlgmr.msra.gmra.mxu1 %vm81_vm2, %v1193_v63  ;;  %v540_v4 = vsel %vm85_vm0, %v538_v3, 0 }
 0x1e2   :  { %508 = vmatpush1.bf16.msra.mxu1 %v488_v1  ;;  %560 = vmatpush1.bf16.msra.mxu0 %v540_v4 }
 0x1e3   :  { %525 = vmatprep.mubr.bf16.mxu1 %v1003_v0  ;;  %v589_v6 = vpop.permute.xlu1 %588  ;;  %917 = vmatprep.subr.bf16.mxu0 %v1006_v18 }
 0x1e4   :  { %v590_v7 = vsel %vm193_vm3, %v587_v5, %v589_v6  ;;  %871 = vmatprep.subr.msk.bf16.mxu1 %vm85_vm0, %v589_v6 }
 0x1e5   :  { %870 = vmatmul.mubr.msk.bf16.vlgmr.msra.gmra.mxu0 %vm81_vm2, %v1100_v12  ;;  %v592_v8 = vsel %vm85_vm0, %v590_v7, 0 }
 0x1e6   :  { %919 = vmatprep.mubr.msk.bf16.mxu0 %vm1007_vm5, %v1006_v18 }
 0x1e9   :  { %868 = vmatmul.mubr.msk.bf16.vlgmr.msra.gmra.mxu1 %vm81_vm2, %v1095_v11 }
 0x1ea   :  { %612 = vmatpush1.bf16.msra.mxu1 %v592_v8  ;;  %629 = vmatprep.mubr.bf16.mxu1 %v1003_v0 }
 0x1eb   :  { %923 = vmatprep.subr.bf16.mxu1 %v1006_v18 }
 0x1f1   :  { %872 = vmatmul.mubr.msk.bf16.vlgmr.msra.gmra.mxu1 %vm81_vm2, %v1113_v17 }
 0x1f2   :  { %925 = vmatprep.mubr.msk.bf16.mxu1 %vm1007_vm5, %v1006_v18 }
 0x222   :  { %v361_v9 = vpop.f32.mrf.mxu0 }
 0x224   :  { %v903_v10 = vpop.f32.mrf.mxu0 }
 0x226   :  { %v364_v12 = vpop.f32.mrf.mxu0 }
 0x228   :  { %v904_v13 = vpop.f32.mrf.mxu0 }
 0x22a   :  { %v1218_v14 = vpop.f32.mrf.mxu0 }
 0x22c   :  { %v915_v15 = vpop.f32.mrf.mxu0 }
 0x22e   :  { %v474_v16 = vpop.f32.mrf.mxu0 }
 0x230   :  { %v916_v11 = vpop.f32.mrf.mxu0 }
 0x299   :  { %v315_v19 = vpop.f32.mrf.mxu1 }
 0x29a   :  { %v362_v22 = vadd.f32 %v361_v9, %v315_v19 }
 0x29b   :  { %v897_v20 = vpop.f32.mrf.mxu1 }
 0x29d   :  { %v318_v0 = vpop.f32.mrf.mxu1 }
 0x29f   :  { %v898_v21 = vpop.f32.mrf.mxu1 }
 0x2a1   :  { %v413_v23 = vpop.f32.mrf.mxu1 }
 0x2a2   :  { %v419_v24 = vadd.f32 %v413_v23, %v362_v22 }
 0x2a3   :  { %v909_v17 = vpop.f32.mrf.mxu1 }
 0x2a5   :  { %v416_v25 = vpop.f32.mrf.mxu1  ;;  %v579_v26 = vpop.f32.mrf.mxu0 }
 0x2a7   :  { %v910_v27 = vpop.f32.mrf.mxu1  ;;  %v581_v28 = vpop.f32.mrf.mxu0 }
 0x2a9   :  { %v527_v29 = vpop.f32.mrf.mxu1  ;;  %v583_v32 = vpop.f32.mrf.mxu0 }
 0x2aa   :  { %v580_v37 = vadd.f32 %v579_v26, %v527_v29 }
 0x2ab   :  { %v529_v33 = vpop.f32.mrf.mxu1  ;;  %v584_v34 = vpop.f32.mrf.mxu0 }
 0x2ac   :  { %v582_v39 = vadd.f32 %v581_v28, %v529_v33 }
 0x2ad   :  { %v531_v35 = vpop.f32.mrf.mxu1 }
 0x2af   :  { %v532_v36 = vpop.f32.mrf.mxu1 }
 0x2b1   :  { %v631_v38 = vpop.f32.mrf.mxu1 }
 0x2b2   :  { %v638_v40 = vadd.f32 %v631_v38, %v580_v37 }
 0x2b3   :  { %v633_v41 = vpop.f32.mrf.mxu1 }
 0x2b4   :  { %v640_v42 = vadd.f32 %v638_v40, %v1119_v30  ;;  %v639_v43 = vadd.f32 %v633_v41, %v582_v39 }
 0x2b5   :  { %v635_v44 = vpop.f32.mrf.mxu1 }
 0x2b6   :  { %v642_v45 = vmax.f32 %v640_v42, 0.0  ;;  %v641_v47 = vadd.f32 %v639_v43, %v1119_v30  ;;  %v64_v30 = vld [vmem:[%s1264_s5] sm:$0xf]  ;;  %s1010_s5 = smov [#allocation5]  }
 0x2b7   :  { %v636_v50 = vpop.f32.mrf.mxu1  ;;  %s843_s7 = sshll.u32 %s1010_s5, 4  ;;  %s844_s7 = int_to_ptr.vmem [resolvable:$true] %s843_s7 }
 0x2b8   :  { %v643_v51 = vmax.f32 %v641_v47, 0.0  ;;  %v644_v52 = vsel %vm259_vm4, %v642_v45, 0.0  ;;  %s976_s12 = scalar_lea.vmem %s844_s7, 64  ;;  %p981_p6 = scmp.lt.s32.totalorder %s844_s7, %s844_s7 }
 0x2b9   :  { %v646_v53 = vpack.c.bf16 %v644_v52, %v644_v52  ;;  %p977_p5 = scmp.ne.s32.totalorder %s844_s7, %s976_s12  ;;  %p982_p7 = scmp.lt.s32.totalorder %s976_s12, %s976_s12 }
 0x2ba   :  { %v647_v54 = vpack.c.bf16 %v643_v51, %v643_v51 }
 0x2bb   :  { %650 = vrot.lane.b32.xlu0 %v646_v53, %s1009_s22  ;;  %v699_v56 = vsel %vm85_vm0, %v646_v53, 0  ;;  %p983_p8 = por %p982_p7, %p981_p6 }
 0x2bc   :  { %652 = vrot.lane.b32.xlu1 %v647_v54, %s1009_s22  ;;  %924 = vmatpush3.bf16.msra.mxu1 %v699_v56 }
 0x2bd   :  { %935 = vmatprep.subr.bf16.mxu1 %v1006_v18  ;;  %p984_p9 = pnand %p983_p8, %p977_p5 }
 0x2bf   :  { %741 = vrot.lane.b32.xlu0 %v646_v53, %s1008_s2  ;;  %926 = vmatmul.mubr.msk.bf16.vlgmr.msra.gmra.mxu1 %vm81_vm2, %v1138_v46 }
 0x2c0   :  { %743 = vrot.lane.b32.xlu1 %v647_v54, %s1008_s2  ;;  %936 = vmatpush3.bf16.msra.mxu1 %v792_v57 }
 0x2c1   :  { %937 = vmatprep.mubr.msk.bf16.mxu1 %vm1007_vm5, %v1006_v18 }
 0x2c3   :  { %422 = vperm.xlu0 %954, %v64_v30  }
 0x2c4   :  { %428 = vperm.xlu1 %955, %v66_v31  }
 0x2c7   :  { %938 = vmatmul.mubr.msk.bf16.vlgmr.msra.gmra.mxu1 %vm81_vm2, %v1161_v49 }
 0x32d   :  { %v651_v46 = vpop.permute.xlu0 %650 }
 0x32e   :  { %v653_v48 = vpop.permute.xlu1 %652 }
 0x32f   :  { %v654_v58 = vsel %vm273_vm6, %v651_v46, %v653_v48 }
 0x330   :  { %v656_v59 = vsel %vm85_vm0, %v654_v58, 0 }
 0x331   :  { %918 = vmatpush3.bf16.msra.mxu0 %v656_v59  ;;  %v742_v60 = vpop.permute.xlu0 %741 }
 0x332   :  { %v744_v61 = vpop.permute.xlu1 %743  ;;  %929 = vmatprep.subr.bf16.mxu0 %v1006_v18 }
 0x333   :  { %v745_v62 = vsel %vm371_vm7, %v742_v60, %v744_v61 }
 0x334   :  { %v747_v1 = vsel %vm85_vm0, %v745_v62, 0  ;;  %920 = vmatmul.mubr.msk.bf16.vlgmr.msra.gmra.mxu0 %vm81_vm2, %v1179_v55 }
 0x335   :  { %930 = vmatpush3.bf16.msra.mxu0 %v747_v1  ;;  %931 = vmatprep.mubr.msk.bf16.mxu0 %vm1007_vm5, %v1006_v18 }
 0x33c   :  { %932 = vmatmul.mubr.msk.bf16.vlgmr.msra.gmra.mxu0 %vm81_vm2, %v1193_v63 }
 0x33e   :  { %v423_v49 = vpop.permute.xlu0 %422 }
 0x33f   :  { %v425_v2 = vadd.f32 %v423_v49, %v419_v24  ;;  %v429_v3 = vpop.permute.xlu1 %428 }
 0x340   :  { %v472_v4 = vadd.f32 %v1218_v14, %v429_v3 }
 0x342   :  { %v477_v5 = vadd.f32 %v472_v4, %v425_v2 }
 0x344   :  { %v478_v6 = vpack.c.bf16 %v477_v5, %v477_v5 }
 0x346   :  { %479 = vst [vmem:[#allocation5] sm:$0x3] %v478_v6 }
 0x37f   :  { %v735_v7 = vpop.f32.mrf.mxu1 }
 0x381   :  { %v927_v8 = vpop.f32.mrf.mxu1 }
 0x383   :  { %v738_v9 = vpop.f32.mrf.mxu1 }
 0x385   :  { %v928_v10 = vpop.f32.mrf.mxu1 }
 0x387   :  { %v828_v55 = vpop.f32.mrf.mxu1 }
 0x388   :  { %v829_v21 = vadd.f32 %v828_v55, %v429_v3 }
 0x389   :  { %v939_v12 = vpop.f32.mrf.mxu1 }
 0x38b   :  { %v831_v13 = vpop.f32.mrf.mxu1 }
 0x38d   :  { %v940_v15 = vpop.f32.mrf.mxu1 }
 0x3f4   :  { %v692_v18 = vpop.f32.mrf.mxu0 }
 0x3f5   :  { %v736_v19 = vadd.f32 %v735_v7, %v692_v18 }
 0x3f6   :  { %v921_v16 = vpop.f32.mrf.mxu0 }
 0x3f8   :  { %v695_v11 = vpop.f32.mrf.mxu0 }
 0x3fa   :  { %v922_v63 = vpop.f32.mrf.mxu0 }
 0x3fc   :  { %v783_v20 = vpop.f32.mrf.mxu0 }
 0x3fd   :  { %v789_v0 = vadd.f32 %v783_v20, %v736_v19 }
 0x3fe   :  { %v933_v14 = vpop.f32.mrf.mxu0 }
 0x3ff   :  { %v790_v22 = vadd.f32 %v789_v0, %v423_v49 }
 0x400   :  { %v786_v23 = vpop.f32.mrf.mxu0 }
 0x401   :  { %v834_v24 = vadd.f32 %v829_v21, %v790_v22 }
 0x402   :  { %v934_v17 = vpop.f32.mrf.mxu0 }
 0x403   :  { %v835_v25 = vpack.c.bf16 %v834_v24, %v834_v24 }
 0x405   :  { %837 = vst [vmem:[#allocation5 + $0x2] sm:$0x3] %v835_v25 }
 0x406   :  { %987 = shalt.err (!%p984_p9)
}
 0x407   :  { %s1011_s13 = smov 32   ;;  %s1012_s1 = smov 2  }
 0x408   :  { %849 = dma.vmem_to_hbm [thread:$0]  %s844_s7, 64, %s1267_s8, [#allocation4], %s1011_s13, %s1011_s13, %s1012_s1  }
 0x409   :  { %998 = dma.done.wait [#allocation4], 64  }
 0x40a   :  { %999 = vsyncadd [#allocation4], 4294967232 }
 0x40b   :  { %853 = vsyncpa [#allocation3], 1 }
 0x40c   :  { %854 = vsyncpa [#allocation4], 1 }

</bundles_post_ra>
